<compile_context>
chip_gen: v6e
topology: v6e:2x2x1
jax: 0.10.0
libtpu: 0.0.40
codegen_flags: <defaults>
</compile_context>

<pallas_src>
import jax
import jax.numpy as jnp
import numpy as np
from jax.experimental import pallas as pl
from jax.experimental.pallas import tpu as pltpu


# ----------------------------- Pallas kernel --------------------------------
def se_kernel(x_ref, w1p_ref, b1_ref, w2e_ref, b2e_ref, o_ref):
    # x_ref  : (TB, C*S)  input tile, native dtype (lane-dense)
    # w1p_ref: (C*S, mid) fused mean-pool + first PHM linear  (W1^T rows repeated, / S)
    # b1_ref : (1, mid)
    # w2e_ref: (mid, C*S) second PHM linear, each channel column repeated S times
    # b2e_ref: (1, C*S)
    # o_ref  : (TB, C*S)
    x = x_ref[...]                                            # keep native dtype

    # Squeeze (mean over S) fused with first PHM linear: one lane-dense matmul.
    h = jnp.dot(x, w1p_ref[...], preferred_element_type=jnp.float32) + b1_ref[...]
    h = jnp.maximum(h, 0.0)                                   # (TB, mid) f32

    # Second PHM linear + sigmoid; columns pre-replicated per channel, so the gate
    # is already broadcast along seq_len (lane-dense, no cross-lane expand needed).
    y = jax.nn.sigmoid(
        jnp.dot(h, w2e_ref[...], preferred_element_type=jnp.float32) + b2e_ref[...]
    )                                                         # (TB, C*S) f32

    # Excitation: elementwise scale in the input's native dtype, lane-dense store.
    o_ref[...] = (x * y.astype(x.dtype)).astype(o_ref.dtype)


def _pick_batch_tile(B, row_bytes):
    """Batch rows per grid step: ~1 MiB input tile, multiple-of-8 sublanes,
    and at least 2 grid steps when possible (so both v7x TensorCores get work)."""
    if B <= 8:
        return B
    target = 1 << 20                                   # ~1 MiB per input tile
    tb = min(B, max(8, target // max(row_bytes, 1)))
    tb = max(8, (tb // 8) * 8)
    if tb >= B:                                        # keep >= 2 parallel grid steps
        tb = max(8, ((B // 2) // 8) * 8)
    return min(tb, B)


def phm_se_block(x, w1, b1, w2, b2):
    """Squeeze-and-Excitation with (pre-composed) PHM linear weights.

    x: (B, C, S); w1: (mid, C); b1: (mid,); w2: (C, mid); b2: (C,).
    """
    B, C, S = x.shape
    mid = w1.shape[0]
    CS = C * S

    # Lane-dense view of the data (pure layout plumbing; reshape is free here).
    x_flat = x.reshape(B, CS)

    # Fold mean-pool into W1^T: W1p[c*S + s, m] = W1[m, c] / S.
    w1p = (jnp.repeat(jnp.asarray(w1).T, S, axis=0) / S).astype(x.dtype)     # (C*S, mid)
    b1r = jnp.asarray(b1, jnp.float32).reshape(1, mid)
    # Replicate each output channel's column S times: W2e[m, c*S + s] = W2[c, m].
    w2e = jnp.repeat(jnp.asarray(w2, jnp.float32).T, S, axis=1)              # (mid, C*S)
    b2e = jnp.repeat(jnp.asarray(b2, jnp.float32), S).reshape(1, CS)

    itemsize = jnp.dtype(x.dtype).itemsize
    tb = _pick_batch_tile(B, CS * itemsize)
    grid = (pl.cdiv(B, tb),)

    cost = pl.CostEstimate(
        flops=2 * B * CS * mid * 2 + 2 * B * CS,       # two small matmuls + gate multiply
        transcendentals=B * CS,                        # sigmoid (replicated form)
        bytes_accessed=2 * B * CS * itemsize + (w1p.size + w2e.size + b2e.size) * 4,
    )

    out_flat = pl.pallas_call(
        se_kernel,
        out_shape=jax.ShapeDtypeStruct((B, CS), x.dtype),
        grid=grid,
        in_specs=[
            pl.BlockSpec((tb, CS), lambda b: (b, 0)),   # batch tile of x (lane-dense)
            pl.BlockSpec((CS, mid), lambda b: (0, 0)),  # resident fused W1
            pl.BlockSpec((1, mid), lambda b: (0, 0)),   # b1
            pl.BlockSpec((mid, CS), lambda b: (0, 0)),  # resident expanded W2
            pl.BlockSpec((1, CS), lambda b: (0, 0)),    # expanded b2
        ],
        out_specs=pl.BlockSpec((tb, CS), lambda b: (b, 0)),
        compiler_params=pltpu.CompilerParams(
            dimension_semantics=("parallel",)),
        cost_estimate=cost,
    )(x_flat, w1p, b1r, w2e, b2e)

    return out_flat.reshape(B, C, S)


# ------------------------- PHM weight composition (glue) --------------------
def phm_compose_weight(A, S):
    """W = sum_i kron(A[i], S[i]).  A: (n, n, n), S: (n, out//n, in//n) -> (out, in)."""
    n = A.shape[0]
    p, q = S.shape[1], S.shape[2]
    W = jnp.einsum('nab,ncd->nacbd', A, S).reshape(n, n * p, n * q)
    return W.sum(axis=0)                                     # (out, in)


# --------------------------------- main --------------------------------------
if __name__ == "__main__":
    # Module hyper-params, consistent with PHM_SEBlock(n, in_channels, reduction):
    n = 2
    in_channels = 16
    reduction = 4
    mid_channels = in_channels // reduction                  # 4
    B, S = 16, 32                                            # C*S = 512 (lane-dense)

    key = jax.random.PRNGKey(0)
    k_x, k_a1, k_s1, k_b1, k_a2, k_s2, k_b2 = jax.random.split(key, 7)

    # Input (batch_size, n_channels, seq_len)
    x = jax.random.normal(k_x, (B, in_channels, S), dtype=jnp.float32)

    # Layer 1: PHMLinear(n=n, in=in_channels, out=mid_channels)
    A1 = jax.random.normal(k_a1, (n, n, n), dtype=jnp.float32) * 0.5
    S1 = jax.random.normal(k_s1, (n, mid_channels // n, in_channels // n),
                           dtype=jnp.float32) * 0.2
    W1 = phm_compose_weight(A1, S1)                          # (mid, in_channels)
    b1 = jax.random.normal(k_b1, (mid_channels,), dtype=jnp.float32) * 0.1

    # Layer 2 (last layer uses n=1): PHMLinear(n=1, in=mid_channels, out=in_channels)
    A2 = jax.random.normal(k_a2, (1, 1, 1), dtype=jnp.float32) * 0.5
    S2 = jax.random.normal(k_s2, (1, in_channels, mid_channels),
                           dtype=jnp.float32) * 0.2
    W2 = phm_compose_weight(A2, S2)                          # (in_channels, mid)
    b2 = jax.random.normal(k_b2, (in_channels,), dtype=jnp.float32) * 0.1

    out = phm_se_block(x, W1, b1, W2, b2)
    out = jax.block_until_ready(out)

    # Pure-JAX reference for correctness.
    pooled = jnp.mean(x, axis=-1)                            # (B, C)
    h = jnp.maximum(pooled @ W1.T + b1, 0.0)                 # (B, mid)
    y = jax.nn.sigmoid(h @ W2.T + b2)                        # (B, C)
    ref = x * y[:, :, None]
    assert out.shape == (B, in_channels, S)
    # Slightly relaxed tolerance: mean-pool is fused into the first matmul, so the
    # f32 accumulation order differs from the reference (error ~1e-6).
    assert np.allclose(np.asarray(out), np.asarray(ref), atol=3e-5, rtol=3e-5)

    print("KERNEL_OK")
</pallas_src>

<mosaic_0001>
module attributes {stable_mosaic.version = 11 : i64} {
  func.func @se_kernel(%arg0: i32, %arg1: memref<8x512xf32, #tpu.memory_space<vmem>>, %arg2: memref<512x4xf32, #tpu.memory_space<vmem>>, %arg3: memref<1x4xf32, #tpu.memory_space<vmem>>, %arg4: memref<4x512xf32, #tpu.memory_space<vmem>>, %arg5: memref<1x512xf32, #tpu.memory_space<vmem>>, %arg6: memref<8x512xf32, #tpu.memory_space<vmem>>) attributes {dimension_semantics = [#tpu.dimension_semantics<parallel>], iteration_bounds = array<i64: 2>, scalar_prefetch = 0 : i64, scratch_operands = 0 : i64, tpu.core_type = #tpu.core_type<tc>, window_params = [{transform_indices = @transform_0, window_bounds = array<i64: 8, 512>}, {pipeline_mode = #tpu.pipeline_mode<synchronous>, transform_indices = @transform_1, window_bounds = array<i64: 512, 4>}, {pipeline_mode = #tpu.pipeline_mode<synchronous>, transform_indices = @transform_2, window_bounds = array<i64: 1, 4>}, {pipeline_mode = #tpu.pipeline_mode<synchronous>, transform_indices = @transform_3, window_bounds = array<i64: 4, 512>}, {pipeline_mode = #tpu.pipeline_mode<synchronous>, transform_indices = @transform_4, window_bounds = array<i64: 1, 512>}, {transform_indices = @transform_5, window_bounds = array<i64: 8, 512>}]} {
    %c0 = arith.constant 0 : index
    %c0_0 = arith.constant 0 : index
    %0 = vector.load %arg1[%c0, %c0_0] : memref<8x512xf32, #tpu.memory_space<vmem>>, vector<8x512xf32>
    %c0_1 = arith.constant 0 : index
    %c0_2 = arith.constant 0 : index
    %1 = vector.load %arg2[%c0_1, %c0_2] : memref<512x4xf32, #tpu.memory_space<vmem>>, vector<512x4xf32>
    %cst = arith.constant dense<0.000000e+00> : vector<8x4xf32>
    %2 = tpu.matmul %0, %1, %cst {dimension_numbers = #tpu.dot_dimension_numbers<[1], [0], [0], [1], [0, 0, 1, 1], [], []>} : vector<8x512xf32>, vector<512x4xf32>, vector<8x4xf32> -> vector<8x4xf32>
    %c0_3 = arith.constant 0 : index
    %c0_4 = arith.constant 0 : index
    %3 = vector.load %arg3[%c0_3, %c0_4] : memref<1x4xf32, #tpu.memory_space<vmem>>, vector<1x4xf32>
    %4 = vector.broadcast %3 : vector<1x4xf32> to vector<8x4xf32>
    %5 = arith.addf %2, %4 : vector<8x4xf32>
    %cst_5 = arith.constant 0.000000e+00 : f32
    %6 = vector.broadcast %cst_5 : f32 to vector<8x4xf32>
    %7 = arith.maximumf %5, %6 : vector<8x4xf32>
    %c0_6 = arith.constant 0 : index
    %c0_7 = arith.constant 0 : index
    %8 = vector.load %arg4[%c0_6, %c0_7] : memref<4x512xf32, #tpu.memory_space<vmem>>, vector<4x512xf32>
    %cst_8 = arith.constant dense<0.000000e+00> : vector<8x512xf32>
    %9 = tpu.matmul %7, %8, %cst_8 {dimension_numbers = #tpu.dot_dimension_numbers<[1], [0], [0], [1], [0, 0, 1, 1], [], []>} : vector<8x4xf32>, vector<4x512xf32>, vector<8x512xf32> -> vector<8x512xf32>
    %c0_9 = arith.constant 0 : index
    %c0_10 = arith.constant 0 : index
    %10 = vector.load %arg5[%c0_9, %c0_10] : memref<1x512xf32, #tpu.memory_space<vmem>>, vector<1x512xf32>
    %11 = vector.broadcast %10 : vector<1x512xf32> to vector<8x512xf32>
    %12 = arith.addf %9, %11 : vector<8x512xf32>
    %13 = arith.negf %12 : vector<8x512xf32>
    %14 = math.exp %13 : vector<8x512xf32>
    %cst_11 = arith.constant 1.000000e+00 : f32
    %15 = vector.broadcast %cst_11 : f32 to vector<8x512xf32>
    %16 = arith.addf %15, %14 : vector<8x512xf32>
    %17 = arith.divf %15, %16 : vector<8x512xf32>
    %18 = arith.mulf %0, %17 : vector<8x512xf32>
    %c0_12 = arith.constant 0 : index
    %c0_13 = arith.constant 0 : index
    %19 = vector.load %arg6[%c0_12, %c0_13] : memref<8x512xf32, #tpu.memory_space<vmem>>, vector<8x512xf32>
    tpu.vector_store %arg6[%c0_12, %c0_13], %18 {strides = array<i32>} : memref<8x512xf32, #tpu.memory_space<vmem>>, vector<8x512xf32>,
    return
  }
  func.func @transform_0(%arg0: i32) -> (i32, i32) {
    %c0_i32 = arith.constant 0 : i32
    %c0_i32_0 = arith.constant 0 : i32
    return %arg0, %c0_i32 : i32, i32
  }
  func.func @transform_1(%arg0: i32) -> (i32, i32) {
    %c0_i32 = arith.constant 0 : i32
    %c0_i32_0 = arith.constant 0 : i32
    %c0_i32_1 = arith.constant 0 : i32
    return %c0_i32, %c0_i32_0 : i32, i32
  }
  func.func @transform_2(%arg0: i32) -> (i32, i32) {
    %c0_i32 = arith.constant 0 : i32
    %c0_i32_0 = arith.constant 0 : i32
    %c0_i32_1 = arith.constant 0 : i32
    return %c0_i32, %c0_i32_0 : i32, i32
  }
  func.func @transform_3(%arg0: i32) -> (i32, i32) {
    %c0_i32 = arith.constant 0 : i32
    %c0_i32_0 = arith.constant 0 : i32
    %c0_i32_1 = arith.constant 0 : i32
    return %c0_i32, %c0_i32_0 : i32, i32
  }
  func.func @transform_4(%arg0: i32) -> (i32, i32) {
    %c0_i32 = arith.constant 0 : i32
    %c0_i32_0 = arith.constant 0 : i32
    %c0_i32_1 = arith.constant 0 : i32
    return %c0_i32, %c0_i32_0 : i32, i32
  }
  func.func @transform_5(%arg0: i32) -> (i32, i32) {
    %c0_i32 = arith.constant 0 : i32
    %c0_i32_0 = arith.constant 0 : i32
    return %arg0, %c0_i32 : i32, i32
  }
}

</mosaic_0001>

<bundles_post_ra>
// kernel: tpu_custom_call.1
= control target key start
LH: loop header
LB: loop body
LE: loop exit
PB: predicated region body
PF: predicated region fallthrough
CT: control target
= control target key end

     0   :  { %10 = vsyncpa [#allocation3], 0  ;;  %s1293_s0 = inlined_call_operand.vmem [shape: f32[16,512], index: 0, kind: input, shape index: {}]   ;;  %s1294_s1 = inlined_call_operand.vmem [shape: f32[512,4], index: 1, kind: input, shape index: {}]   ;;  %s1295_s2 = inlined_call_operand.vmem [shape: f32[1,4], index: 2, kind: input, shape index: {}]   ;;  %s1296_s3 = inlined_call_operand.vmem [shape: f32[4,512], index: 3, kind: input, shape index: {}]   ;;  %s1297_s4 = inlined_call_operand.vmem [shape: f32[1,512], index: 4, kind: input, shape index: {}]   ;;  %s1298_s5 = inlined_call_operand.hbm [shape: f32[16,512], index: 5, kind: output, shape index: {}]  }
   0x1   :  { %12 = vsyncpa [#allocation3 + $0x1], 0  ;;  %s975_s18 = smov 0   ;;  %s977_s19 = smov 0  }
   0x2   :  { %s979_s20 = smov 0   ;;  %s981_s21 = smov 0  }
   0x3 LB: > { %s996_s22 = sadd.s32 4294967295, %s941_s21   ;;  %s728_s23 = sadd.s32 4294967294, %s941_s21   ;;  %s941_s21 = sphi %s981_s21, %s1304_s21   ;;  %s937_s20 = sphi %s979_s20, %s1303_s20   ;;  %s933_s19 = sphi %s977_s19, %s1302_s19   ;;  %s929_s18 = sphi %s975_s18, %s1301_s18  }
   0x4   : > { %s1000_s24 = sadd.s32 1, %s941_s21   ;;  %s135_s25 = sadd.s32 1, %s937_s20 }
   0x5   : > { %s132_s26 = ssub.s32 %s941_s21, %s1000_s24  ;;  %p145_p0 = scmp.ne.s32.totalorder %s937_s20, %s933_s19 }
   0x6   : > { %p133_p1 = scmp.eq.s32.totalorder %s132_s26, 0  ;;  %p146_p2 = scmp.eq.s32.totalorder %s996_s22, 1 }
   0x7   : > { %p151_p3 = scmp.ne.s32.totalorder %s933_s19, %s929_s18  ;;  %p152_p4 = scmp.eq.s32.totalorder %s728_s23, 1 }
   0x8   : > { %s1011_s27 = scalar_select %p133_p1, %s937_s20, %s135_s25  }
   0x9   : > { %p1013_p5 = por %p146_p2, %p145_p0  ;;  %p1017_p6 = por %p152_p4, %p151_p3 }
   0xa   : > { %p731_p7 = scmp.ge.s32.totalorder %s941_s21, 1  ;;  %p190_p8 = scmp.lt.s32.totalorder %s941_s21, 3 }
   0xc   : > { %p191_p9 = pnand %p731_p7, %p190_p8 }
   0xd   : > { %p218_p10 = scmp.lt.s32.totalorder (!%p191_p9), %s996_s22, 1  ;;  %s215_s26 = sand.u32 (!%p191_p9), 1, %s933_s19  }
   0xe   : > { %194 = sbr.rel (%p191_p9) target bundleno = 502 (0x1f6), region = 40  ;;  %s732_s30 = sshll.u32 (!%p191_p9), %s215_s26, 5 }
   0xf   : > { %s752_s6 = sshll.u32 (!%p191_p9), %s996_s22, 9  ;;  %s217_s7 = scalar_lea.vmem (!%p191_p9), [#allocation2], %s732_s30 }
  0x10   : > { %s1258_s9 = scalar_lea.hbm (!%p191_p9), %s1298_s5, %s752_s6  ;;  %s944_s11 = smov (!%p191_p9), [#allocation2]  }
  0x11   : > { %s885_s12 = sshll.u32 (!%p191_p9), %s944_s11, 4  ;;  %s886_s12 = int_to_ptr.vmem [resolvable:$false] %s885_s12 }
  0x12   : > { %s887_s16 = scalar_lea.vmem (!%p191_p9), %s886_s12, 1024 }
  0x13   : > { %v258_v0 = vld [vmem:[%s1294_s1 + $0xf8] sm:$0xff]  ;;  %v257_v4 = vld [vmem:[%s1294_s1 + $0xf0] sm:$0xff]  ;;  %v256_v8 = vld [vmem:[%s1294_s1 + $0xe8] sm:$0xff]  ;;  %s1159_s13 = scalar_select %p218_p10, %s996_s22, 1  ;;  %vm471_vm0 = vcmask 1043456   ;;  %vm467_vm1 = vcmask 31744  }
  0x14   : > { %v290_v1 = vld [vmem:[%s1294_s1 + $0x1f8] sm:$0xff]  ;;  %753 = vmatprep.subr.mxu0 %v258_v0  ;;  %v289_v5 = vld [vmem:[%s1294_s1 + $0x1f0] sm:$0xff]  ;;  %v288_v9 = vld [vmem:[%s1294_s1 + $0x1e8] sm:$0xff]  ;;  %s655_s22 = scalar_lea.sflag [#allocation3], %s215_s26 }
  0x15   : > { %v242_v2 = vld [vmem:[%s1294_s1 + $0x78] sm:$0xff]  ;;  %788 = vmatprep.subr.mxu1 %v290_v1  ;;  %v241_v6 = vld [vmem:[%s1294_s1 + $0x70] sm:$0xff]  ;;  %v240_v10 = vld [vmem:[%s1294_s1 + $0x68] sm:$0xff]  ;;  %s751_s15 = sshll.u32 %s1159_s13, 5 }
  0x16   : > { %v274_v3 = vld [vmem:[%s1294_s1 + $0x178] sm:$0xff]  ;;  %754 = vmatpush3.msra.mxu0 %v242_v2  ;;  %v273_v7 = vld [vmem:[%s1294_s1 + $0x170] sm:$0xff]  ;;  %v272_v11 = vld [vmem:[%s1294_s1 + $0x168] sm:$0xff]  ;;  %s222_s14 = scalar_lea.vmem %s1293_s0, %s751_s15  ;;  %s669_s15 = sshll.u32 %s217_s7, 4  ;;  %s670_s15 = int_to_ptr.vmem [resolvable:$true] %s669_s15 }
  0x17   : > { %789 = vmatpush3.msra.mxu1 %v274_v3  ;;  %755 = vmatprep.subr.mxu0 %v257_v4  ;;  %v255_v12 = vld [vmem:[%s1294_s1 + $0xe0] sm:$0xff]  ;;  %v254_v16 = vld [vmem:[%s1294_s1 + $0xd8] sm:$0xff]  ;;  %v253_v20 = vld [vmem:[%s1294_s1 + $0xd0] sm:$0xff]  ;;  %s881_s10 = scalar_lea.vmem %s670_s15, 512  ;;  %p888_p0 = scmp.lt.s32.totalorder %s670_s15, %s886_s12 }
  0x18   : > { %790 = vmatprep.subr.mxu1 %v289_v5  ;;  %756 = vmatpush3.msra.mxu0 %v241_v6  ;;  %v287_v13 = vld [vmem:[%s1294_s1 + $0x1e0] sm:$0xff]  ;;  %v286_v17 = vld [vmem:[%s1294_s1 + $0x1d8] sm:$0xff]  ;;  %v285_v21 = vld [vmem:[%s1294_s1 + $0x1d0] sm:$0xff]  ;;  %p882_p11 = scmp.ne.s32.totalorder %s670_s15, %s881_s10  ;;  %p889_p1 = scmp.lt.s32.totalorder %s887_s16, %s881_s10 }
  0x19   : > { %791 = vmatpush3.msra.mxu1 %v273_v7  ;;  %757 = vmatprep.subr.mxu0 %v256_v8  ;;  %v239_v14 = vld [vmem:[%s1294_s1 + $0x60] sm:$0xff]  ;;  %v238_v18 = vld [vmem:[%s1294_s1 + $0x58] sm:$0xff]  ;;  %v237_v22 = vld [vmem:[%s1294_s1 + $0x50] sm:$0xff]  ;;  %v943_v8 = vmov 0.0  }
  0x1a   : > { %792 = vmatprep.subr.mxu1 %v288_v9  ;;  %v271_v15 = vld [vmem:[%s1294_s1 + $0x160] sm:$0xff]  ;;  %758 = vmatpush3.msra.mxu0 %v240_v10  ;;  %v270_v19 = vld [vmem:[%s1294_s1 + $0x158] sm:$0xff]  ;;  %v269_v23 = vld [vmem:[%s1294_s1 + $0x150] sm:$0xff]  ;;  %p883_p12 = pnand %p882_p11, %p1013_p5  ;;  %p890_p2 = por %p889_p1, %p888_p0 }
  0x1b   : > { %793 = vmatpush3.msra.mxu1 %v272_v11  ;;  %759 = vmatprep.subr.mxu0 %v255_v12  ;;  %v252_v24 = vld [vmem:[%s1294_s1 + $0xc8] sm:$0xff]  ;;  %v251_v28 = vld [vmem:[%s1294_s1 + $0xc0] sm:$0xff]  ;;  %v250_v32 = vld [vmem:[%s1294_s1 + $0xb8] sm:$0xff] }
  0x1c   : > { %794 = vmatprep.subr.mxu1 %v287_v13  ;;  %760 = vmatpush3.msra.mxu0 %v239_v14  ;;  %v284_v25 = vld [vmem:[%s1294_s1 + $0x1c8] sm:$0xff]  ;;  %v283_v29 = vld [vmem:[%s1294_s1 + $0x1c0] sm:$0xff]  ;;  %v282_v33 = vld [vmem:[%s1294_s1 + $0x1b8] sm:$0xff]  ;;  %p884_p13 = pneg %p883_p12 }
  0x1d   : > { %795 = vmatpush3.msra.mxu1 %v271_v15  ;;  %761 = vmatprep.subr.mxu0 %v254_v16  ;;  %v236_v26 = vld [vmem:[%s1294_s1 + $0x48] sm:$0xff]  ;;  %v235_v30 = vld [vmem:[%s1294_s1 + $0x40] sm:$0xff]  ;;  %v234_v34 = vld [vmem:[%s1294_s1 + $0x38] sm:$0xff] }
  0x1e   : > { %796 = vmatprep.subr.mxu1 %v286_v17  ;;  %762 = vmatpush3.msra.mxu0 %v238_v18  ;;  %v268_v27 = vld [vmem:[%s1294_s1 + $0x148] sm:$0xff]  ;;  %v267_v31 = vld [vmem:[%s1294_s1 + $0x140] sm:$0xff]  ;;  %v266_v35 = vld [vmem:[%s1294_s1 + $0x138] sm:$0xff]  ;;  %p891_p3 = pnand %p890_p2, %p884_p13 }
  0x1f   : > { %797 = vmatpush3.msra.mxu1 %v270_v19  ;;  %763 = vmatprep.subr.mxu0 %v253_v20  ;;  %v249_v36 = vld [vmem:[%s1294_s1 + $0xb0] sm:$0xff]  ;;  %v248_v40 = vld [vmem:[%s1294_s1 + $0xa8] sm:$0xff]  ;;  %v247_v44 = vld [vmem:[%s1294_s1 + $0xa0] sm:$0xff]  ;;  %v443_v19 = vlaneseq }
  0x20   : > { %798 = vmatprep.subr.mxu1 %v285_v21  ;;  %764 = vmatpush3.msra.mxu0 %v237_v22  ;;  %v281_v37 = vld [vmem:[%s1294_s1 + $0x1b0] sm:$0xff]  ;;  %v280_v41 = vld [vmem:[%s1294_s1 + $0x1a8] sm:$0xff]  ;;  %v279_v45 = vld [vmem:[%s1294_s1 + $0x1a0] sm:$0xff] }
  0x21   : > { %799 = vmatpush3.msra.mxu1 %v269_v23  ;;  %765 = vmatprep.subr.mxu0 %v252_v24  ;;  %v233_v38 = vld [vmem:[%s1294_s1 + $0x30] sm:$0xff]  ;;  %v232_v42 = vld [vmem:[%s1294_s1 + $0x28] sm:$0xff]  ;;  %v231_v46 = vld [vmem:[%s1294_s1 + $0x20] sm:$0xff]  ;;  %v444_v20 = vshrl.u32 %v443_v19, 7 }
  0x22   : > { %800 = vmatprep.subr.mxu1 %v284_v25  ;;  %766 = vmatpush3.msra.mxu0 %v236_v26  ;;  %v265_v39 = vld [vmem:[%s1294_s1 + $0x130] sm:$0xff]  ;;  %v264_v43 = vld [vmem:[%s1294_s1 + $0x128] sm:$0xff]  ;;  %v263_v47 = vld [vmem:[%s1294_s1 + $0x120] sm:$0xff] }
  0x23   : > { %801 = vmatpush3.msra.mxu1 %v268_v27  ;;  %767 = vmatprep.subr.mxu0 %v251_v28  ;;  %v246_v48 = vld [vmem:[%s1294_s1 + $0x98] sm:$0xff]  ;;  %v245_v52 = vld [vmem:[%s1294_s1 + $0x90] sm:$0xff]  ;;  %v244_v56 = vld [vmem:[%s1294_s1 + $0x88] sm:$0xff]  ;;  %v445_v21 = vsub.s32 0, %v444_v20  ;;  %v453_v22 = vsub.s32 2, %v444_v20  ;;  %v449_v24 = vsub.s32 1, %v444_v20 }
  0x24   : > { %802 = vmatprep.subr.mxu1 %v283_v29  ;;  %768 = vmatpush3.msra.mxu0 %v235_v30  ;;  %v278_v49 = vld [vmem:[%s1294_s1 + $0x198] sm:$0xff]  ;;  %v277_v53 = vld [vmem:[%s1294_s1 + $0x190] sm:$0xff]  ;;  %v276_v57 = vld [vmem:[%s1294_s1 + $0x188] sm:$0xff]  ;;  %v457_v25 = vsub.s32 3, %v444_v20 }
  0x25   : > { %803 = vmatpush3.msra.mxu1 %v267_v31  ;;  %769 = vmatprep.subr.mxu0 %v250_v32  ;;  %v230_v50 = vld [vmem:[%s1294_s1 + $0x18] sm:$0xff]  ;;  %v229_v54 = vld [vmem:[%s1294_s1 + $0x10] sm:$0xff]  ;;  %v228_v58 = vld [vmem:[%s1294_s1 + $0x8] sm:$0xff] }
  0x26   : > { %804 = vmatprep.subr.mxu1 %v282_v33  ;;  %770 = vmatpush3.msra.mxu0 %v234_v34  ;;  %v262_v51 = vld [vmem:[%s1294_s1 + $0x118] sm:$0xff]  ;;  %v261_v55 = vld [vmem:[%s1294_s1 + $0x110] sm:$0xff]  ;;  %v260_v59 = vld [vmem:[%s1294_s1 + $0x108] sm:$0xff] }
  0x27   : > { %805 = vmatpush3.msra.mxu1 %v266_v35  ;;  %771 = vmatprep.subr.mxu0 %v249_v36  ;;  %v243_v60 = vld [vmem:[%s1294_s1 + $0x80] sm:$0xff]  ;;  %v1222_v63 = vld [vmem:[%s222_s14 + $0x8] sm:$0xff]  ;;  %v1227_v1 = vld [vmem:[%s222_s14 + $0x18] sm:$0xff] }
  0x28   : > { %806 = vmatprep.subr.mxu1 %v281_v37  ;;  %772 = vmatpush3.msra.mxu0 %v233_v38  ;;  %v275_v61 = vld [vmem:[%s1294_s1 + $0x180] sm:$0xff]  ;;  %v1231_v3 = vld [vmem:[%s222_s14 + $0x10] sm:$0xff]  ;;  %v440_v5 = vld [vmem:[%s1296_s3 + $0x8] sm:$0xff] }
  0x29   : > { %807 = vmatpush3.msra.mxu1 %v265_v39  ;;  %773 = vmatprep.subr.mxu0 %v248_v40  ;;  %v227_v62 = vld [vmem:[%s1294_s1] sm:$0xff]  ;;  %v466_v7 = vcombine.high %v440_v5, %v440_v5 }
  0x2a   : > { %808 = vmatprep.subr.mxu1 %v280_v41  ;;  %774 = vmatpush3.msra.mxu0 %v232_v42  ;;  %v259_v0 = vld [vmem:[%s1294_s1 + $0x100] sm:$0xff] }
  0x2b   : > { %809 = vmatpush3.msra.mxu1 %v264_v43  ;;  %775 = vmatprep.subr.mxu0 %v247_v44  ;;  %v1229_v2 = vld [vmem:[%s222_s14] sm:$0xff] }
  0x2c   : > { %810 = vmatprep.subr.mxu1 %v279_v45  ;;  %776 = vmatpush3.msra.mxu0 %v231_v46  ;;  %v439_v4 = vld [vmem:[%s1296_s3] sm:$0xff] }
  0x2d   : > { %811 = vmatpush3.msra.mxu1 %v263_v47  ;;  %777 = vmatprep.subr.mxu0 %v246_v48  ;;  %v465_v6 = vcombine.high %v439_v4, %v439_v4  ;;  %v735_v11 = vld [vmem:[%s1295_s2] ss:$0 sm:$0xff] }
  0x2e   : > { %812 = vmatprep.subr.mxu1 %v278_v49  ;;  %778 = vmatpush3.msra.mxu0 %v230_v50  ;;  %v441_v23 = vld [vmem:[%s1297_s4] sm:$0xf] }
  0x2f   : > { %813 = vmatpush3.msra.mxu1 %v262_v51  ;;  %779 = vmatprep.subr.mxu0 %v245_v52  ;;  %v446_v26 = vrot.slane %v441_v23, %v445_v21  ;;  %v454_v27 = vrot.slane %v441_v23, %v453_v22  ;;  %v450_v28 = vrot.slane %v441_v23, %v449_v24 }
  0x30   : > { %814 = vmatprep.subr.mxu1 %v277_v53  ;;  %780 = vmatpush3.msra.mxu0 %v229_v54  ;;  %v458_v29 = vrot.slane %v441_v23, %v457_v25 }
  0x31   : > { %815 = vmatpush3.msra.mxu1 %v261_v55  ;;  %781 = vmatprep.subr.mxu0 %v244_v56 }
  0x32   : > { %816 = vmatprep.subr.mxu1 %v276_v57  ;;  %782 = vmatpush3.msra.mxu0 %v228_v58 }
  0x33   : > { %817 = vmatpush3.msra.mxu1 %v260_v59  ;;  %783 = vmatprep.subr.mxu0 %v243_v60 }
  0x34   : > { %818 = vmatprep.subr.mxu1 %v275_v61  ;;  %784 = vmatpush3.msra.mxu0 %v227_v62 }
  0x35   : > { %362 = vmatprep.mubr.f32.mxu0 %v1222_v63  ;;  %819 = vmatpush3.msra.mxu1 %v259_v0 }
  0x36   : > { %432 = vmatprep.mubr.f32.mxu1 %v1227_v1  ;;  %363 = vmatmul.mubr.f32.vlgmr.msra.gmra.mxu0 %v1229_v2 }
  0x37   : > { %433 = vmatmul.mubr.f32.vlgmr.msra.gmra.mxu1 %v1231_v3  ;;  %736 = vmatprep.subr.msk.mxu0 %vm471_vm0, %v465_v6 }
  0x38   : > { %739 = vmatprep.subr.msk.mxu1 %vm471_vm0, %v466_v7  ;;  %737 = vmatpush1.msk.msra.mxu0 %vm471_vm0, %v439_v4 }
  0x39   : > { %740 = vmatpush1.msk.msra.mxu1 %vm471_vm0, %v440_v5  ;;  %544 = vmatprep.mubr.f32.mxu0 %v943_v8 }
  0x3a   : > { %615 = vmatprep.mubr.f32.mxu1 %v943_v8 }
  0xf6   : > { %v785_v9 = vpop.f32.mrf.mxu0 }
  0xf7   : > { %v820_v10 = vpop.f32.mrf.mxu1 }
  0xf8   : > { %v786_v12 = vpop.f32.mrf.mxu0 }
  0xf9   : > { %v821_v13 = vpop.f32.mrf.mxu1  ;;  %v787_v14 = vadd.f32 %v786_v12, %v785_v9 }
  0xfa   : > { %v822_v16 = vadd.f32 %v821_v13, %v820_v10 }
  0xfb   : > { %v365_v15 = vadd.f32 %v787_v14, %v735_v11 }
  0xfd   : > { %v435_v17 = vadd.f32 %v822_v16, %v365_v15 }
  0xff   : > { %v438_v18 = vmax.f32 %v435_v17, 0.0 }
 0x101   : > { %738 = vmatmul.mubr.msk.f32.vlgmr.msra.gmra.mxu0 %vm467_vm1, %v438_v18  ;;  %741 = vmatmul.mubr.msk.f32.vlgmr.msra.gmra.mxu1 %vm467_vm1, %v438_v18 }
 0x1c1   : > { %v546_v30 = vpop.f32.mrf.mxu0  ;;  %v617_v31 = vpop.f32.mrf.mxu1 }
 0x1c2   : > { %v547_v32 = vadd.f32 %v546_v30, %v446_v26  ;;  %v618_v33 = vadd.f32 %v617_v31, %v454_v27 }
 0x1c3   : > { %v548_v34 = vpop.f32.mrf.mxu0  ;;  %v619_v35 = vpop.f32.mrf.mxu1 }
 0x1c4   : > { %v742_v36 = vmul.f32 -1.442695, %v547_v32  ;;  %v744_v37 = vmul.f32 -1.442695, %v618_v33  ;;  %v549_v38 = vadd.f32 %v548_v34, %v450_v28  ;;  %v620_v39 = vadd.f32 %v619_v35, %v458_v29 }
 0x1c6   : > { %865 = vpow2.f32 %v742_v36  ;;  %v743_v40 = vmul.f32 -1.442695, %v549_v38  ;;  %v745_v41 = vmul.f32 -1.442695, %v620_v39 }
 0x1c7   : > { %867 = vpow2.f32 %v744_v37 }
 0x1c8   : > { %869 = vpow2.f32 %v743_v40 }
 0x1c9   : > { %871 = vpow2.f32 %v745_v41 }
 0x1d3   : > { %v866_v42 = vpop.eup %865 }
 0x1d4   : > { %v868_v43 = vpop.eup %867  ;;  %v634_v44 = vadd.f32 1.0, %v866_v42 }
 0x1d5   : > { %v870_v45 = vpop.eup %869  ;;  %v636_v46 = vadd.f32 1.0, %v868_v43 }
 0x1d6   : > { %v872_v47 = vpop.eup %871  ;;  %873 = vrcp.f32 %v634_v44  ;;  %v635_v48 = vadd.f32 1.0, %v870_v45 }
 0x1d7   : > { %875 = vrcp.f32 %v636_v46  ;;  %v637_v49 = vadd.f32 1.0, %v872_v47 }
 0x1d8   : > { %877 = vrcp.f32 %v635_v48 }
 0x1d9   : > { %879 = vrcp.f32 %v637_v49 }
 0x1e3   : > { %v874_v50 = vpop.eup %873 }
 0x1e4   : > { %v876_v51 = vpop.eup %875  ;;  %v646_v52 = vmul.f32 %v874_v50, %v1229_v2 }
 0x1e5   : > { %v878_v53 = vpop.eup %877  ;;  %v648_v54 = vmul.f32 %v876_v51, %v1231_v3 }
 0x1e6   : > { %v880_v55 = vpop.eup %879  ;;  %v647_v56 = vmul.f32 %v878_v53, %v1222_v63  ;;  %650 = vst [vmem:[%s217_s7] sm:$0xff] %v646_v52 }
 0x1e7   : > { %v649_v57 = vmul.f32 %v880_v55, %v1227_v1  ;;  %652 = vst [vmem:[%s217_s7 + $0x10] sm:$0xff] %v648_v54 }
 0x1e8   : > { %651 = vst [vmem:[%s217_s7 + $0x8] sm:$0xff] %v647_v56 }
 0x1e9   : > { %653 = vst [vmem:[%s217_s7 + $0x18] sm:$0xff] %v649_v57 }
 0x1ea   : > { %894 = shalt.err (!%p891_p3)
}
 0x1eb   : > { %s895_s14 = scalar_lea.hbm %s1258_s9, 512  ;;  %s899_s25 = scalar_lea.hbm %s1298_s5, 1024 }
 0x1ec   : > { %p896_p4 = scmp.ne.s32.totalorder %s1258_s9, %s895_s14  ;;  %p900_p9 = scmp.lt.s32.totalorder %s1258_s9, %s1298_s5 }
 0x1ed   : > { %p901_p10 = scmp.lt.s32.totalorder %s899_s25, %s895_s14 }
 0x1ee   : > { %p897_p7 = pnand %p896_p4, %p1013_p5 }
 0x1ef   : > { %p902_p11 = por %p901_p10, %p900_p9 }
 0x1f0   : > { %p898_p8 = pneg %p897_p7 }
 0x1f2   : > { %p903_p12 = pnand %p902_p11, %p898_p8 }
 0x1f4   : > { %906 = shalt.err (!%p903_p12)
}
 0x1f5   : > { %823 = dma.vmem_to_hbm [thread:$0]  (%p1013_p5), %s670_s15, 512, %s1258_s9, %s655_s22  }
 0x1f6 PF: > { %p829_p13 = scmp.ge.s32.totalorder %s941_s21, 2  ;;  %s681_s6 = sand.u32 1, %s929_s18  }
 0x1f7   : > { %s682_s7 = scalar_lea.sflag [#allocation3], %s681_s6 }
 0x1f8   : > { %p826_p0 = pnand %p829_p13, %p1017_p6 }
 0x1fa   : > { %p827_p1 = pneg %p826_p0 }
 0x1fc   : > { %924 = dma.done.wait (%p827_p1), %s682_s7, 512  }
 0x1fd   : > { %926 = vsyncadd (%p827_p1), %s682_s7, 4294966784  ;;  %p15_p2 = scmp.ge.s32.totalorder %s1000_s24, 4   ;;  %s1301_s18 = smov %s933_s19 }
 0x1fe   : > { %s1302_s19 = smov %s937_s20  ;;  %s1303_s20 = smov %s1011_s27 }
 0x1ff   : > { %s1304_s21 = smov %s1000_s24  ;;  %17 = sbr.rel (!%p15_p2) target bundleno = 3 (0x3), region = 75 }
 0x204   :  { %687 = vsyncpa [#allocation3], 1 }
 0x205   :  { %689 = vsyncpa [#allocation3 + $0x1], 1 }

</bundles_post_ra>
